<compile_context>
chip_gen: v5e
topology: v5e:2x2
jax: 0.10.0
libtpu: 0.0.40
codegen_flags: <defaults>
</compile_context>

<pallas_src>
import functools

import jax
import jax.numpy as jnp
from jax import lax
from jax.experimental import pallas as pl
from jax.experimental.pallas import tpu as pltpu

L = 0.01  # the global `l` in the PyTorch script


def vnet_kernel(x_ref, w1_ref, b1_ref, w2_ref, b2_ref, y_ref, *, chunk_n):
    w1 = w1_ref[...]      # (H, D)   PyTorch layout (n_hidden, n_input)
    b1 = b1_ref[...]      # (H, 1)
    w2 = w2_ref[...]      # (H, 1)
    b2 = b2_ref[0]        # scalar bias from SMEM

    tile_n = x_ref.shape[1]
    n_chunks = tile_n // chunk_n          # static

    def body(c, carry):
        off = pl.multiple_of(c * chunk_n, chunk_n)
        xb = x_ref[:, pl.ds(off, chunk_n)]                     # (D, chunk)

        # Layer 1 on the MXU: (H, D) @ (D, chunk) -> (H, chunk).  K = D = 4 is
        # tiny, but the MXU / vector-extended slots are otherwise idle and this
        # takes ~85% of the VALU work off the saturated vector ALUs.
        # HIGHEST precision keeps full f32 accuracy (no bf16 operand cast).
        pre = jnp.dot(w1, xb,
                      preferred_element_type=jnp.float32,
                      precision=lax.Precision.HIGHEST)
        h = jnp.tanh(pre + b1)                                 # EUP, (H, chunk)

        # Layer 2 (n_output == 1): w2-weighted sublane reduce (XLU slot).
        out = jnp.sum(w2 * h, axis=0, keepdims=True) + b2      # (1, chunk)

        # y = l*x^2 + (x*out)^2 ; (1, chunk) broadcasts over the D rows.
        xo = xb * out
        y_ref[:, pl.ds(off, chunk_n)] = L * xb * xb + xo * xo
        return carry

    # Chunked loop bounds live vreg ranges; fully unroll short trip counts.
    lax.fori_loop(0, n_chunks, body, 0,
                  unroll=True if n_chunks <= 8 else 8)


def vnet_forward(x, w1, b1, w2, b2, *, tile_n=8192, chunk_n=512):
    """x: (N, D); weights in PyTorch layout: w1 (H, D), b1 (H,), w2 (1, H),
    b2 (1,). Returns y: (N, D)."""
    N, D = x.shape
    H = w1.shape[0]
    assert w2.shape[0] == 1  # same assumption the PyTorch module relies on

    # --- lane-tile sizing ---------------------------------------------------
    n128 = pl.cdiv(N, 128) * 128                               # lane-rounded N
    chunk_n = max(128, (min(chunk_n, n128) // 128) * 128)      # multiple of 128
    # Largest chunk-multiple tile <= requested, but small enough that large
    # batches produce >= 2 grid steps (megacore work-splitting on v7x).
    max_tile = max(chunk_n, (tile_n // chunk_n) * chunk_n)
    half = max(chunk_n, pl.cdiv(pl.cdiv(n128, 2), chunk_n) * chunk_n)
    tile_n = min(max_tile, half)
    grid_n = pl.cdiv(N, tile_n)            # partial last block is masked

    # Transposed layout: batch rides the 128-lane axis (lane-dense vld/vst).
    # TODO(synk): for a training loop, keep activations persistently in (D, N)
    # layout to avoid this extra HBM pass on x and y.
    x_t = x.astype(jnp.float32).T          # (D, N)

    kernel = functools.partial(vnet_kernel, chunk_n=chunk_n)

    y_t = pl.pallas_call(
        kernel,
        out_shape=jax.ShapeDtypeStruct((D, N), jnp.float32),
        grid_spec=pltpu.PrefetchScalarGridSpec(
            num_scalar_prefetch=0,
            grid=(grid_n,),
            in_specs=[
                pl.BlockSpec((D, tile_n), lambda i: (0, i)),        # x tile (lane-dense)
                pl.BlockSpec((H, D), lambda i: (0, 0)),             # W1 (fetched once)
                pl.BlockSpec((H, 1), lambda i: (0, 0)),             # b1 column
                pl.BlockSpec((H, 1), lambda i: (0, 0)),             # W2 column
                pl.BlockSpec(memory_space=pltpu.MemorySpace.SMEM),  # b2 scalar
            ],
            out_specs=pl.BlockSpec((D, tile_n), lambda i: (0, i)),
        ),
        compiler_params=pltpu.CompilerParams(
            dimension_semantics=("parallel",),
        ),
    )(
        x_t,
        w1.astype(jnp.float32),
        b1.astype(jnp.float32).reshape(H, 1),
        w2.astype(jnp.float32).reshape(H, 1),
        b2.astype(jnp.float32).reshape(1),
    )

    return y_t.T


def init_params(key, n_input, n_hidden, n_output):
    # Deterministic init mimicking torch.nn.Linear defaults:
    # U(-1/sqrt(fan_in), 1/sqrt(fan_in)) for both weight and bias.
    k1, k2, k3, k4 = jax.random.split(key, 4)
    bound1 = 1.0 / jnp.sqrt(jnp.float32(n_input))
    bound2 = 1.0 / jnp.sqrt(jnp.float32(n_hidden))
    w1 = jax.random.uniform(k1, (n_hidden, n_input), jnp.float32, -bound1, bound1)
    b1 = jax.random.uniform(k2, (n_hidden,), jnp.float32, -bound1, bound1)
    w2 = jax.random.uniform(k3, (n_output, n_hidden), jnp.float32, -bound2, bound2)
    b2 = jax.random.uniform(k4, (n_output,), jnp.float32, -bound2, bound2)
    return w1, b1, w2, b2


def vnet_reference(x, w1, b1, w2, b2):
    h = jnp.tanh(jnp.dot(x, w1.T, precision=lax.Precision.HIGHEST) + b1)
    out = jnp.dot(h, w2.T, precision=lax.Precision.HIGHEST) + b2
    return L * x * x + (x * out) ** 2


if __name__ == "__main__":
    # Small shapes consistent with the module: VNet(n_input, n_hidden, n_output).
    n_input, n_hidden, n_output = 4, 32, 1
    batch = 640  # 2 grid steps of 512 lanes; last block is partial (masked)

    key = jax.random.PRNGKey(0)
    kx, kp = jax.random.split(key)
    x = jax.random.normal(kx, (batch, n_input), dtype=jnp.float32)
    w1, b1, w2, b2 = init_params(kp, n_input, n_hidden, n_output)

    # Small tile/chunk so this test exercises: multi-step grid, the in-kernel
    # chunk loop (2 chunks/tile), and the masked partial last block.
    y = vnet_forward(x, w1, b1, w2, b2, tile_n=512, chunk_n=256)
    y = jax.block_until_ready(y)

    y_ref = vnet_reference(x, w1, b1, w2, b2)
    assert y.shape == (batch, n_input)
    assert jnp.allclose(y, y_ref, atol=1e-5, rtol=1e-5), float(
        jnp.max(jnp.abs(y - y_ref)))

    print("KERNEL_OK")
</pallas_src>

<mosaic_0001>
module attributes {stable_mosaic.version = 11 : i64} {
  func.func @vnet_kernel(%arg0: i32, %arg1: memref<4x512xf32, #tpu.memory_space<vmem>>, %arg2: memref<32x4xf32, #tpu.memory_space<vmem>>, %arg3: memref<32x1xf32, #tpu.memory_space<vmem>>, %arg4: memref<32x1xf32, #tpu.memory_space<vmem>>, %arg5: memref<1xf32, #tpu.memory_space<smem>>, %arg6: memref<4x512xf32, #tpu.memory_space<vmem>>) attributes {dimension_semantics = [#tpu.dimension_semantics<parallel>], iteration_bounds = array<i64: 2>, scalar_prefetch = 0 : i64, scratch_operands = 0 : i64, tpu.core_type = #tpu.core_type<tc>, window_params = [{transform_indices = @transform_0, window_bounds = array<i64: 4, 512>}, {pipeline_mode = #tpu.pipeline_mode<synchronous>, transform_indices = @transform_1, window_bounds = array<i64: 32, 4>}, {pipeline_mode = #tpu.pipeline_mode<synchronous>, transform_indices = @transform_2, window_bounds = array<i64: 32, 1>}, {pipeline_mode = #tpu.pipeline_mode<synchronous>, transform_indices = @transform_3, window_bounds = array<i64: 32, 1>}, {transform_indices = @transform_4, window_bounds = array<i64: 1>}, {transform_indices = @transform_5, window_bounds = array<i64: 4, 512>}]} {
    %c0 = arith.constant 0 : index
    %c0_0 = arith.constant 0 : index
    %0 = vector.load %arg2[%c0, %c0_0] : memref<32x4xf32, #tpu.memory_space<vmem>>, vector<32x4xf32>
    %c0_1 = arith.constant 0 : index
    %c0_2 = arith.constant 0 : index
    %1 = vector.load %arg3[%c0_1, %c0_2] : memref<32x1xf32, #tpu.memory_space<vmem>>, vector<32x1xf32>
    %c0_3 = arith.constant 0 : index
    %c0_4 = arith.constant 0 : index
    %2 = vector.load %arg4[%c0_3, %c0_4] : memref<32x1xf32, #tpu.memory_space<vmem>>, vector<32x1xf32>
    %c0_5 = arith.constant 0 : index
    %3 = memref.load %arg5[%c0_5] : memref<1xf32, #tpu.memory_space<smem>>
    %c0_i32 = arith.constant 0 : i32
    %c256_i32 = arith.constant 256 : i32
    %4 = arith.muli %c0_i32, %c256_i32 : i32
    %5 = tpu.assume_multiple %4, 256 : i32
    %c0_6 = arith.constant 0 : index
    %6 = arith.index_cast %5 : i32 to index
    %7 = vector.load %arg1[%c0_6, %6] : memref<4x512xf32, #tpu.memory_space<vmem>>, vector<4x256xf32>
    %cst = arith.constant dense<0.000000e+00> : vector<32x256xf32>
    %8 = tpu.matmul %0, %7, %cst {dimension_numbers = #tpu.dot_dimension_numbers<[1], [0], [0], [1], [0, 0, 1, 1], [], []>, precision = #tpu.contract_precision<fp32>} : vector<32x4xf32>, vector<4x256xf32>, vector<32x256xf32> -> vector<32x256xf32>
    %9 = vector.broadcast %1 : vector<32x1xf32> to vector<32x256xf32>
    %10 = arith.addf %8, %9 : vector<32x256xf32>
    %11 = math.tanh %10 : vector<32x256xf32>
    %12 = vector.broadcast %2 : vector<32x1xf32> to vector<32x256xf32>
    %13 = arith.mulf %12, %11 : vector<32x256xf32>
    %cst_7 = arith.constant dense<0.000000e+00> : vector<256xf32>
    %14 = vector.multi_reduction <add>, %13, %cst_7 [0] : vector<32x256xf32> to vector<256xf32>
    %15 = vector.shape_cast %14 : vector<256xf32> to vector<1x256xf32>
    %16 = vector.broadcast %3 : f32 to vector<1x256xf32>
    %17 = arith.addf %15, %16 : vector<1x256xf32>
    %18 = vector.broadcast %17 : vector<1x256xf32> to vector<4x256xf32>
    %19 = arith.mulf %7, %18 : vector<4x256xf32>
    %cst_8 = arith.constant 0.00999999977 : f32
    %20 = vector.broadcast %cst_8 : f32 to vector<4x256xf32>
    %21 = arith.mulf %20, %7 : vector<4x256xf32>
    %22 = arith.mulf %21, %7 : vector<4x256xf32>
    %23 = arith.mulf %19, %19 : vector<4x256xf32>
    %24 = arith.addf %22, %23 : vector<4x256xf32>
    %c0_9 = arith.constant 0 : index
    %25 = arith.index_cast %5 : i32 to index
    %26 = vector.load %arg6[%c0_9, %25] : memref<4x512xf32, #tpu.memory_space<vmem>>, vector<4x256xf32>
    tpu.vector_store %arg6[%c0_9, %25], %24 {strides = array<i32>} : memref<4x512xf32, #tpu.memory_space<vmem>>, vector<4x256xf32>,
    %c1_i32 = arith.constant 1 : i32
    %c256_i32_10 = arith.constant 256 : i32
    %27 = arith.muli %c1_i32, %c256_i32_10 : i32
    %28 = tpu.assume_multiple %27, 256 : i32
    %c0_11 = arith.constant 0 : index
    %29 = arith.index_cast %28 : i32 to index
    %30 = vector.load %arg1[%c0_11, %29] : memref<4x512xf32, #tpu.memory_space<vmem>>, vector<4x256xf32>
    %cst_12 = arith.constant dense<0.000000e+00> : vector<32x256xf32>
    %31 = tpu.matmul %0, %30, %cst_12 {dimension_numbers = #tpu.dot_dimension_numbers<[1], [0], [0], [1], [0, 0, 1, 1], [], []>, precision = #tpu.contract_precision<fp32>} : vector<32x4xf32>, vector<4x256xf32>, vector<32x256xf32> -> vector<32x256xf32>
    %32 = vector.broadcast %1 : vector<32x1xf32> to vector<32x256xf32>
    %33 = arith.addf %31, %32 : vector<32x256xf32>
    %34 = math.tanh %33 : vector<32x256xf32>
    %35 = vector.broadcast %2 : vector<32x1xf32> to vector<32x256xf32>
    %36 = arith.mulf %35, %34 : vector<32x256xf32>
    %cst_13 = arith.constant dense<0.000000e+00> : vector<256xf32>
    %37 = vector.multi_reduction <add>, %36, %cst_13 [0] : vector<32x256xf32> to vector<256xf32>
    %38 = vector.shape_cast %37 : vector<256xf32> to vector<1x256xf32>
    %39 = vector.broadcast %3 : f32 to vector<1x256xf32>
    %40 = arith.addf %38, %39 : vector<1x256xf32>
    %41 = vector.broadcast %40 : vector<1x256xf32> to vector<4x256xf32>
    %42 = arith.mulf %30, %41 : vector<4x256xf32>
    %cst_14 = arith.constant 0.00999999977 : f32
    %43 = vector.broadcast %cst_14 : f32 to vector<4x256xf32>
    %44 = arith.mulf %43, %30 : vector<4x256xf32>
    %45 = arith.mulf %44, %30 : vector<4x256xf32>
    %46 = arith.mulf %42, %42 : vector<4x256xf32>
    %47 = arith.addf %45, %46 : vector<4x256xf32>
    %c0_15 = arith.constant 0 : index
    %48 = arith.index_cast %28 : i32 to index
    %49 = vector.load %arg6[%c0_15, %48] : memref<4x512xf32, #tpu.memory_space<vmem>>, vector<4x256xf32>
    tpu.vector_store %arg6[%c0_15, %48], %47 {strides = array<i32>} : memref<4x512xf32, #tpu.memory_space<vmem>>, vector<4x256xf32>,
    %c2_i32 = arith.constant 2 : i32
    return
  }
  func.func @transform_0(%arg0: i32) -> (i32, i32) {
    %c0_i32 = arith.constant 0 : i32
    %c0_i32_0 = arith.constant 0 : i32
    return %c0_i32, %arg0 : i32, i32
  }
  func.func @transform_1(%arg0: i32) -> (i32, i32) {
    %c0_i32 = arith.constant 0 : i32
    %c0_i32_0 = arith.constant 0 : i32
    %c0_i32_1 = arith.constant 0 : i32
    return %c0_i32, %c0_i32_0 : i32, i32
  }
  func.func @transform_2(%arg0: i32) -> (i32, i32) {
    %c0_i32 = arith.constant 0 : i32
    %c0_i32_0 = arith.constant 0 : i32
    %c0_i32_1 = arith.constant 0 : i32
    return %c0_i32, %c0_i32_0 : i32, i32
  }
  func.func @transform_3(%arg0: i32) -> (i32, i32) {
    %c0_i32 = arith.constant 0 : i32
    %c0_i32_0 = arith.constant 0 : i32
    %c0_i32_1 = arith.constant 0 : i32
    return %c0_i32, %c0_i32_0 : i32, i32
  }
  func.func @transform_4(%arg0: i32) -> i32 {
    %c0_i32 = arith.constant 0 : i32
    %c0_i32_0 = arith.constant 0 : i32
    return %c0_i32 : i32
  }
  func.func @transform_5(%arg0: i32) -> (i32, i32) {
    %c0_i32 = arith.constant 0 : i32
    %c0_i32_0 = arith.constant 0 : i32
    return %c0_i32, %arg0 : i32, i32
  }
}

</mosaic_0001>

<bundles_post_ra>
// kernel: tpu_custom_call.1
= control target key start
LH: loop header
LB: loop body
LE: loop exit
PB: predicated region body
PF: predicated region fallthrough
CT: control target
= control target key end

     0   :  { %s2055_s0 = inlined_call_operand.vmem [shape: f32[4,640], index: 0, kind: input, shape index: {}]   ;;  %s2056_s1 = inlined_call_operand.vmem [shape: f32[32,4], index: 1, kind: input, shape index: {}]   ;;  %s2057_s2 = inlined_call_operand.vmem [shape: f32[32,1], index: 2, kind: input, shape index: {}]   ;;  %s2058_s3 = inlined_call_operand.vmem [shape: f32[32,1], index: 3, kind: input, shape index: {}]   ;;  %s2059_s4 = inlined_call_operand.<no memory space> [shape: f32[1], index: 4, kind: input, shape index: {}]   ;;  %s2060_s5 = inlined_call_operand.hbm [shape: f32[4,640], index: 5, kind: output, shape index: {}]  }
   0x1   :  { %10 = sst [smem:[#allocation2]] %s2059_s4 }
   0x2   :  { %11 = vsyncpa [#allocation4], 0 }
   0x3   :  { %13 = vsyncpa [#allocation4 + $0x1], 0  ;;  %s1675_s20 = smov 0   ;;  %s1677_s21 = smov 0  }
   0x4   :  { %s1679_s22 = smov 0   ;;  %s1681_s23 = smov 0  }
   0x5 LB: > { %s1696_s4 = sadd.s32 4294967295, %s1638_s23   ;;  %s1472_s24 = sadd.s32 4294967294, %s1638_s23   ;;  %s1638_s23 = sphi %s1681_s23, %s2067_s23   ;;  %s1634_s22 = sphi %s1679_s22, %s2066_s22   ;;  %s1630_s21 = sphi %s1677_s21, %s2065_s21   ;;  %s1626_s20 = sphi %s1675_s20, %s2064_s20  }
   0x6   : > { %s1700_s25 = sadd.s32 1, %s1638_s23   ;;  %s136_s26 = sadd.s32 1, %s1634_s22 }
   0x7   : > { %s133_s27 = ssub.s32 %s1638_s23, %s1700_s25  ;;  %p146_p0 = scmp.ne.s32.totalorder %s1634_s22, %s1630_s21 }
   0x8   : > { %p134_p1 = scmp.eq.s32.totalorder %s133_s27, 0  ;;  %p147_p2 = scmp.eq.s32.totalorder %s1696_s4, 1 }
   0x9   : > { %p152_p3 = scmp.ne.s32.totalorder %s1630_s21, %s1626_s20  ;;  %p153_p4 = scmp.eq.s32.totalorder %s1472_s24, 1 }
   0xa   : > { %s1711_s28 = scalar_select %p134_p1, %s1634_s22, %s136_s26  }
   0xb   : > { %p1713_p5 = por %p147_p2, %p146_p0  ;;  %p1717_p6 = por %p153_p4, %p152_p3 }
   0xc   : > { %p1475_p7 = scmp.ge.s32.totalorder %s1638_s23, 1  ;;  %p200_p8 = scmp.lt.s32.totalorder %s1638_s23, 3 }
   0xe   : > { %p201_p9 = pnand %p1475_p7, %p200_p8 }
   0xf   : > { %s1724_s6 = sshll.u32 (!%p201_p9), %s1696_s4, 2  ;;  %s229_s24 = sand.u32 (!%p201_p9), 1, %s1630_s21  }
  0x10   : > { %204 = sbr.rel (%p201_p9) target bundleno = 427 (0x1ab), region = 40  ;;  %p237_p10 = scmp.lt.s32.totalorder (!%p201_p9), %s1724_s6, 4 }
  0x11   : > { %s263_s26 = sld [smem:[#allocation2]] (!%p201_p9)  ;;  %s1476_s27 = sshll.u32 (!%p201_p9), %s229_s24, 4 }
  0x12   : > { %s1977_s7 = scalar_lea.vmem (!%p201_p9), [#allocation3], %s1476_s27  ;;  %s2002_s8 = scalar_lea.sflag (!%p201_p9), [#allocation4], %s229_s24 }
  0x15   : > { %v251_v0 = vld [vmem:[%s2056_s1] sm:$0xff]  ;;  %vm289_vm0 = vcmask 31744   ;;  %v252_v3 = vld [vmem:[%s2056_s1 + $0x8] sm:$0xff]  ;;  %s238_s11 = scalar_select %p237_p10, %s1724_s6, 4  ;;  %v1640_v5 = vmov 0   ;;  %v253_v11 = vld [vmem:[%s2056_s1 + $0x10] sm:$0xff] }
  0x16   : > { %v291_v1 = vsel %vm289_vm0, %v251_v0, 0  ;;  %1530 = vset.pattern.permute.xlu0 %v1640_v5  ;;  %v255_v6 = vld [vmem:[%s2057_s2] sm:$0xff]  ;;  %1531 = vset.pattern.permute.xlu1 %v1640_v5  ;;  %v294_v7 = vsel %vm289_vm0, %v252_v3, 0  ;;  %v297_v12 = vsel %vm289_vm0, %v253_v11, 0  ;;  %v256_v15 = vld [vmem:[%s2057_s2 + $0x8] sm:$0xff]  ;;  %vm302_vm1 = vcmask 1043456  }
  0x17   : > { %v1731_v2 = vand.u32 4294901760, %v291_v1  ;;  %s1478_s14 = sshll.u32 %s238_s11, 2  ;;  %267 = vperm.xlu0 %1530, %v255_v6   ;;  %1532 = vset.pattern.permute.xlu2 %v1640_v5  ;;  %v1753_v10 = vand.u32 4294901760, %v294_v7  ;;  %v1769_v17 = vand.u32 4294901760, %v297_v12  ;;  %v254_v26 = vld [vmem:[%s2056_s1 + $0x18] sm:$0xff]  ;;  %v257_v31 = vld [vmem:[%s2057_s2 + $0x10] sm:$0xff] }
  0x18   : > { %s240_s17 = scalar_lea.vmem %s2055_s0, %s1478_s14  ;;  %v300_v34 = vsel %vm289_vm0, %v254_v26, 0  ;;  %277 = vperm.xlu1 %1531, %v257_v31   ;;  %v258_v44 = vld [vmem:[%s2057_s2 + $0x18] sm:$0xff]  ;;  %v261_v54 = vld [vmem:[%s2058_s3 + $0x10] sm:$0xff]  ;;  %v259_v57 = vld [vmem:[%s2058_s3] sm:$0xff]  ;;  %s1398_s9 = ssub.s32 (%p1713_p5), 5, %s1724_s6 }
  0x19   : > { %v1738_v4 = vsub.f32 %v291_v1, %v1731_v2  ;;  %v1747_v8 = vld [vmem:[%s240_s17] sm:$0xff]  ;;  %v1762_v14 = vsub.f32 %v294_v7, %v1753_v10  ;;  %v1767_v16 = vld [vmem:[%s240_s17 + $0x8] sm:$0xff]  ;;  %v1787_v30 = vsub.f32 %v297_v12, %v1769_v17  ;;  %v1799_v39 = vand.u32 4294901760, %v300_v34  ;;  %v262_v58 = vld [vmem:[%s2058_s3 + $0x18] sm:$0xff]  ;;  %795 = vperm.xlu2 %1532, %v259_v57   ;;  %p1399_p11 = scmp.lt.s32.totalorder (%p1713_p5), %s1398_s9, 4 }
  0x1a   : > { %286 = vst [vmem:[#allocation1] ss:$2 sm:$0xff] %v1747_v8  ;;  %v260_v59 = vld [vmem:[%s2058_s3 + $0x8] sm:$0xff] }
  0x1b   : > { %v1751_v9 = vand.u32 4294901760, %v1738_v4  ;;  %v1777_v23 = vand.u32 4294901760, %v1762_v14  ;;  %v1797_v38 = vand.u32 4294901760, %v1787_v30  ;;  %v1806_v43 = vsub.f32 %v300_v34, %v1799_v39 }
  0x1d   : > { %v327_v13 = vsub.f32 %v1738_v4, %v1751_v9  ;;  %v335_v29 = vsub.f32 %v1762_v14, %v1777_v23  ;;  %v343_v42 = vsub.f32 %v1787_v30, %v1797_v38  ;;  %v1816_v46 = vand.u32 4294901760, %v1806_v43 }
  0x1f   : > { %272 = vperm.xlu0 %1530, %v256_v15   ;;  %v1772_v21 = vand.u32 4294901760, %v327_v13  ;;  %v1794_v37 = vand.u32 4294901760, %v335_v29  ;;  %v1813_v45 = vand.u32 4294901760, %v343_v42  ;;  %v351_v47 = vsub.f32 %v1806_v43, %v1816_v46 }
  0x20   : > { %282 = vperm.xlu1 %1531, %v258_v44  }
  0x21   : > { %v287_v18 = vld.sshfl [vmem:[#allocation1] sm:$0xff pattern:$0x75316420]  ;;  %v288_v19 = vld.sshfl [vmem:[#allocation1 + $0x8] sm:$0xff pattern:$0x75316420]  ;;  %800 = vperm.xlu2 %1532, %v260_v59  }
  0x22   : > { %v303_v20 = vsel %vm302_vm1, %v287_v18, 0  ;;  %v305_v22 = vsel %vm302_vm1, %v288_v19, 0  ;;  %856 = vst [vmem:[#allocation1] ss:$2 sm:$0xff] %v1767_v16  ;;  %v1824_v48 = vand.u32 4294901760, %v351_v47 }
  0x23   : > { %v322_v24 = vand.u32 4294901760, %v303_v20  ;;  %v561_v25 = vand.u32 4294901760, %v305_v22 }
  0x25   : > { %323 = vmatpush.msra.mxu0 %v322_v24  ;;  %v373_v27 = vsub.f32 %v303_v20, %v322_v24  ;;  %450 = vmatpush.msra.mxu3 %v322_v24  ;;  %v612_v28 = vsub.f32 %v305_v22, %v561_v25 }
  0x26   : > { %329 = vmatmul.f32.vlgmr.msra.gmra.mxu0 %v1772_v21  ;;  %454 = vmatmul.f32.vlgmr.msra.gmra.mxu3 %v1751_v9 }
  0x27   : > { %412 = vmatpush.msra.mxu2 %v373_v27  ;;  %v374_v32 = vand.u32 4294901760, %v373_v27  ;;  %v613_v33 = vand.u32 4294901760, %v612_v28  ;;  %805 = vperm.xlu0 %1530, %v261_v54  }
  0x28   : > { %415 = vmatmul.f32.vlgmr.msra.gmra.mxu2 %v1738_v4  ;;  %810 = vperm.xlu1 %1531, %v262_v58  }
  0x29   : > { %562 = vmatpush.msrb.mxu2 %v561_v25  ;;  %v375_v35 = vsub.f32 %v373_v27, %v374_v32  ;;  %494 = vmatpush.msrb.mxu0 %v374_v32  ;;  %v614_v36 = vsub.f32 %v612_v28, %v613_v33  ;;  %v857_v49 = vld.sshfl [vmem:[#allocation1] sm:$0xff pattern:$0x75316420]  ;;  %v858_v60 = vld.sshfl [vmem:[#allocation1 + $0x8] sm:$0xff pattern:$0x75316420] }
  0x2a   : > { %v859_v50 = vsel %vm302_vm1, %v857_v49, 0  ;;  %v861_v61 = vsel %vm302_vm1, %v858_v60, 0 }
  0x2b   : > { %733 = vmatpush.msra.mxu2 %v613_v33  ;;  %651 = vmatpush.msra.mxu0 %v612_v28  ;;  %v376_v40 = vand.u32 4294901760, %v375_v35  ;;  %v615_v41 = vand.u32 4294901760, %v614_v36  ;;  %v878_v51 = vand.u32 4294901760, %v859_v50  ;;  %v1117_v62 = vand.u32 4294901760, %v861_v61 }
  0x2d   : > { %377 = vmatpush.msra.mxu1 %v376_v40  ;;  %616 = vmatpush.msrb.mxu3 %v615_v41  ;;  %v929_v52 = vsub.f32 %v859_v50, %v878_v51  ;;  %v1168_v63 = vsub.f32 %v861_v61, %v1117_v62 }
  0x2e   : > { %337 = vmatmul.f32.gmra.mxu0 %v1794_v37  ;;  %379 = vmatmul.f32.vlgmr.msra.gmra.mxu1 %v1731_v2 }
  0x2f   : > { %528 = vmatpush.msrb.mxu1 %v322_v24  ;;  %460 = vmatmul.f32.gmra.mxu3 %v1777_v23  ;;  %v930_v53 = vand.u32 4294901760, %v929_v52  ;;  %v1169_v0 = vand.u32 4294901760, %v1168_v63 }
  0x30   : > { %420 = vmatmul.f32.gmra.mxu2 %v1762_v14  ;;  %767 = vmatpush.msra.mxu3 %v561_v25 }
  0x31   : > { %689 = vmatpush.msra.mxu1 %v561_v25  ;;  %v931_v55 = vsub.f32 %v929_v52, %v930_v53  ;;  %v1170_v1 = vsub.f32 %v1168_v63, %v1169_v0 }
  0x33   : > { %v932_v56 = vand.u32 4294901760, %v931_v55  ;;  %v1171_v3 = vand.u32 4294901760, %v1170_v1 }
  0x36   : > { %345 = vmatmul.f32.gmra.mxu0 %v1813_v45  ;;  %383 = vmatmul.f32.gmra.mxu1 %v1753_v10 }
  0x37   : > { %466 = vmatmul.f32.gmra.mxu3 %v1797_v38 }
  0x38   : > { %425 = vmatmul.f32.gmra.mxu2 %v1787_v30 }
  0x3e   : > { %353 = vmatmul.f32.gmra.mxu0 %v1824_v48  ;;  %387 = vmatmul.f32.gmra.mxu1 %v1769_v17 }
  0x3f   : > { %472 = vmatmul.f32.gmra.mxu3 %v1816_v46 }
  0x40   : > { %430 = vmatmul.f32.gmra.mxu2 %v1806_v43 }
  0x46   : > { %391 = vmatmul.f32.gmra.mxu1 %v1799_v39  ;;  %496 = vmatmul.f32.vlgmr.msrb.gmra.mxu0 %v1731_v2 }
  0x47   : > { %618 = vmatmul.f32.vlgmr.msrb.gmra.mxu3 %v1731_v2  ;;  %879 = vmatpush.msrb.mxu0 %v878_v51 }
  0x48   : > { %568 = vmatmul.f32.vlgmr.msrb.gmra.mxu2 %v1772_v21  ;;  %1006 = vmatpush.msrb.mxu3 %v878_v51 }
  0x49   : > { %968 = vmatpush.msrb.mxu2 %v929_v52 }
  0x4e   : > { %500 = vmatmul.f32.gmra.mxu0 %v1753_v10  ;;  %530 = vmatmul.f32.vlgmr.msrb.gmra.mxu1 %v1731_v2 }
  0x4f   : > { %622 = vmatmul.f32.gmra.mxu3 %v1753_v10  ;;  %933 = vmatpush.msrb.mxu1 %v932_v56 }
  0x50   : > { %576 = vmatmul.f32.gmra.mxu2 %v1794_v37 }
  0x56   : > { %504 = vmatmul.f32.gmra.mxu0 %v1769_v17  ;;  %534 = vmatmul.f32.gmra.mxu1 %v1753_v10 }
  0x57   : > { %626 = vmatmul.f32.gmra.mxu3 %v1769_v17 }
  0x58   : > { %584 = vmatmul.f32.gmra.mxu2 %v1813_v45 }
  0x5e   : > { %508 = vmatmul.f32.gmra.mxu0 %v1799_v39  ;;  %538 = vmatmul.f32.gmra.mxu1 %v1769_v17 }
  0x5f   : > { %630 = vmatmul.f32.gmra.mxu3 %v1799_v39 }
  0x60   : > { %592 = vmatmul.f32.gmra.mxu2 %v1824_v48 }
  0x66   : > { %542 = vmatmul.f32.gmra.mxu1 %v1799_v39  ;;  %654 = vmatmul.f32.vlgmr.msra.gmra.mxu0 %v1738_v4 }
  0x67   : > { %769 = vmatmul.f32.vlgmr.msra.gmra.mxu3 %v1731_v2  ;;  %1050 = vmatpush.msra.mxu0 %v930_v53 }
  0x68   : > { %735 = vmatmul.f32.vlgmr.msra.gmra.mxu2 %v1731_v2  ;;  %1172 = vmatpush.msra.mxu3 %v1171_v3 }
  0x69   : > { %1118 = vmatpush.msra.mxu2 %v1117_v62 }
  0x6e   : > { %659 = vmatmul.f32.gmra.mxu0 %v1762_v14  ;;  %693 = vmatmul.f32.vlgmr.msra.gmra.mxu1 %v1751_v9 }
  0x6f   : > { %773 = vmatmul.f32.gmra.mxu3 %v1753_v10  ;;  %1084 = vmatpush.msra.mxu1 %v878_v51 }
  0x70   : > { %739 = vmatmul.f32.gmra.mxu2 %v1753_v10 }
  0x73   : > { %v1930_v55 = vpop.permute.xlu2 %795 }
  0x76   : > { %664 = vmatmul.f32.gmra.mxu0 %v1787_v30  ;;  %699 = vmatmul.f32.gmra.mxu1 %v1777_v23 }
  0x77   : > { %777 = vmatmul.f32.gmra.mxu3 %v1769_v17 }
  0x78   : > { %743 = vmatmul.f32.gmra.mxu2 %v1769_v17 }
  0x7e   : > { %669 = vmatmul.f32.gmra.mxu0 %v1806_v43  ;;  %705 = vmatmul.f32.gmra.mxu1 %v1797_v38 }
  0x7f   : > { %781 = vmatmul.f32.gmra.mxu3 %v1799_v39 }
  0x80   : > { %747 = vmatmul.f32.gmra.mxu2 %v1799_v39 }
  0x86   : > { %711 = vmatmul.f32.gmra.mxu1 %v1816_v46  ;;  %885 = vmatmul.f32.vlgmr.msrb.gmra.mxu0 %v1772_v21 }
  0x87   : > { %1010 = vmatmul.f32.vlgmr.msrb.gmra.mxu3 %v1751_v9  ;;  %1207 = vmatpush.msrb.mxu0 %v1168_v63 }
  0x88   : > { %971 = vmatmul.f32.vlgmr.msrb.gmra.mxu2 %v1738_v4  ;;  %1323 = vmatpush.msrb.mxu3 %v1117_v62 }
  0x89   : > { %1289 = vmatpush.msrb.mxu2 %v1169_v0  ;;  %v1892_v6 = vpop.permute.xlu0 %267 }
  0x8a   : > { %v1907_v29 = vpop.permute.xlu1 %277 }
  0x8e   : > { %893 = vmatmul.f32.gmra.mxu0 %v1794_v37  ;;  %935 = vmatmul.f32.vlgmr.msrb.gmra.mxu1 %v1731_v2 }
  0x8f   : > { %1016 = vmatmul.f32.gmra.mxu3 %v1777_v23  ;;  %1245 = vmatpush.msrb.mxu1 %v1117_v62 }
  0x90   : > { %976 = vmatmul.f32.gmra.mxu2 %v1762_v14 }
  0x91   : > { %v1900_v19 = vpop.permute.xlu0 %272 }
  0x96   : > { %901 = vmatmul.f32.gmra.mxu0 %v1813_v45  ;;  %939 = vmatmul.f32.gmra.mxu1 %v1753_v10 }
  0x97   : > { %1022 = vmatmul.f32.gmra.mxu3 %v1797_v38 }
  0x98   : > { %981 = vmatmul.f32.gmra.mxu2 %v1787_v30 }
  0x9e   : > { %909 = vmatmul.f32.gmra.mxu0 %v1824_v48  ;;  %943 = vmatmul.f32.gmra.mxu1 %v1769_v17 }
  0x9f   : > { %1028 = vmatmul.f32.gmra.mxu3 %v1816_v46 }
  0xa0   : > { %986 = vmatmul.f32.gmra.mxu2 %v1806_v43 }
  0xa3   : > { %v330_v5 = vpop.f32.mrf.mxu0 }
  0xa4   : > { %v331_v7 = vadd.f32 %v330_v5, %v1892_v6  ;;  %v1946_v5 = vpop.permute.xlu0 %805 }
  0xa6   : > { %947 = vmatmul.f32.gmra.mxu1 %v1799_v39  ;;  %1052 = vmatmul.f32.vlgmr.msra.gmra.mxu0 %v1731_v2 }
  0xa7   : > { %1174 = vmatmul.f32.vlgmr.msra.gmra.mxu3 %v1731_v2 }
  0xa8   : > { %1124 = vmatmul.f32.vlgmr.msra.gmra.mxu2 %v1772_v21 }
  0xa9   : > { %v455_v11 = vpop.f32.mrf.mxu3 }
  0xab   : > { %v338_v12 = vpop.f32.mrf.mxu0  ;;  %v380_v13 = vpop.f32.mrf.mxu1 }
  0xac   : > { %v381_v15 = vadd.f32 %v380_v13, %v331_v7  ;;  %v416_v18 = vpop.f32.mrf.mxu2  ;;  %v339_v21 = vadd.f32 %v338_v12, %v1900_v19 }
  0xae   : > { %v417_v20 = vadd.f32 %v416_v18, %v381_v15  ;;  %1056 = vmatmul.f32.gmra.mxu0 %v1753_v10  ;;  %1086 = vmatmul.f32.vlgmr.msra.gmra.mxu1 %v1731_v2 }
  0xaf   : > { %1178 = vmatmul.f32.gmra.mxu3 %v1753_v10 }
  0xb0   : > { %v456_v22 = vadd.f32 %v455_v11, %v417_v20  ;;  %1132 = vmatmul.f32.gmra.mxu2 %v1794_v37 }
  0xb2   : > { %v461_v24 = vpop.f32.mrf.mxu3 }
  0xb3   : > { %v346_v25 = vpop.f32.mrf.mxu0  ;;  %v384_v26 = vpop.f32.mrf.mxu1 }
  0xb4   : > { %v385_v27 = vadd.f32 %v384_v26, %v339_v21  ;;  %v421_v28 = vpop.f32.mrf.mxu2  ;;  %v347_v33 = vadd.f32 %v346_v25, %v1907_v29 }
  0xb6   : > { %v422_v31 = vadd.f32 %v421_v28, %v385_v27  ;;  %1060 = vmatmul.f32.gmra.mxu0 %v1769_v17  ;;  %1090 = vmatmul.f32.gmra.mxu1 %v1753_v10 }
  0xb7   : > { %1182 = vmatmul.f32.gmra.mxu3 %v1769_v17 }
  0xb8   : > { %v462_v32 = vadd.f32 %v461_v24, %v422_v31  ;;  %1140 = vmatmul.f32.gmra.mxu2 %v1813_v45 }
  0xba   : > { %v467_v34 = vpop.f32.mrf.mxu3 }
  0xbb   : > { %v1914_v35 = vpop.f32.mrf.mxu0  ;;  %v388_v36 = vpop.f32.mrf.mxu1 }
  0xbc   : > { %v389_v37 = vadd.f32 %v388_v36, %v347_v33  ;;  %v426_v40 = vpop.f32.mrf.mxu2 }
  0xbe   : > { %v427_v41 = vadd.f32 %v426_v40, %v389_v37  ;;  %1064 = vmatmul.f32.gmra.mxu0 %v1799_v39  ;;  %1094 = vmatmul.f32.gmra.mxu1 %v1769_v17 }
  0xbf   : > { %1186 = vmatmul.f32.gmra.mxu3 %v1799_v39 }
  0xc0   : > { %v468_v42 = vadd.f32 %v467_v34, %v427_v41  ;;  %1148 = vmatmul.f32.gmra.mxu2 %v1824_v48 }
  0xc2   : > { %v1920_v44 = vpop.f32.mrf.mxu3 }
  0xc3   : > { %v392_v45 = vpop.f32.mrf.mxu1  ;;  %v497_v47 = vpop.f32.mrf.mxu0 }
  0xc4   : > { %v431_v49 = vpop.f32.mrf.mxu2  ;;  %v498_v54 = vadd.f32 %v497_v47, %v456_v22 }
  0xc6   : > { %1098 = vmatmul.f32.gmra.mxu1 %v1799_v39  ;;  %1210 = vmatmul.f32.vlgmr.msrb.gmra.mxu0 %v1738_v4 }
  0xc7   : > { %1325 = vmatmul.f32.vlgmr.msrb.gmra.mxu3 %v1731_v2 }
  0xc8   : > { %1291 = vmatmul.f32.vlgmr.msrb.gmra.mxu2 %v1731_v2 }
  0xca   : > { %v619_v50 = vpop.f32.mrf.mxu3 }
  0xcb   : > { %v501_v51 = vpop.f32.mrf.mxu0  ;;  %v531_v52 = vpop.f32.mrf.mxu1 }
  0xcc   : > { %v569_v53 = vpop.f32.mrf.mxu2  ;;  %v532_v48 = vadd.f32 %v531_v52, %v498_v54  ;;  %v502_v4 = vadd.f32 %v501_v51, %v462_v32 }
  0xcd   : > { %v570_v27 = vadd.f32 %v569_v53, %v1892_v6 }
  0xce   : > { %1215 = vmatmul.f32.gmra.mxu0 %v1762_v14  ;;  %1249 = vmatmul.f32.vlgmr.msrb.gmra.mxu1 %v1751_v9  ;;  %1533 = vtanh.f32 %v532_v48  ;;  %v1936_v14 = vpop.permute.xlu2 %800 }
  0xcf   : > { %1329 = vmatmul.f32.gmra.mxu3 %v1753_v10  ;;  %v620_v33 = vadd.f32 %v619_v50, %v570_v27 }
  0xd0   : > { %1295 = vmatmul.f32.gmra.mxu2 %v1753_v10 }
  0xd2   : > { %v623_v56 = vpop.f32.mrf.mxu3 }
  0xd3   : > { %v505_v57 = vpop.f32.mrf.mxu0  ;;  %v535_v2 = vpop.f32.mrf.mxu1 }
  0xd4   : > { %v536_v58 = vadd.f32 %v535_v2, %v502_v4  ;;  %v577_v59 = vpop.f32.mrf.mxu2  ;;  %v1534_v9 = vpop.eup %1533  ;;  %v506_v10 = vadd.f32 %v505_v57, %v468_v42 }
  0xd5   : > { %v813_v3 = vmul.f32 %v1534_v9, %v1930_v55  ;;  %v578_v26 = vadd.f32 %v577_v59, %v1900_v19 }
  0xd6   : > { %1535 = vtanh.f32 %v536_v58  ;;  %1220 = vmatmul.f32.gmra.mxu0 %v1787_v30  ;;  %1255 = vmatmul.f32.gmra.mxu1 %v1777_v23  ;;  %v1944_v23 = vpop.permute.xlu1 %282 }
  0xd7   : > { %1333 = vmatmul.f32.gmra.mxu3 %v1769_v17  ;;  %v624_v31 = vadd.f32 %v623_v56, %v578_v26 }
  0xd8   : > { %1299 = vmatmul.f32.gmra.mxu2 %v1769_v17 }
  0xda   : > { %v627_v60 = vpop.f32.mrf.mxu3 }
  0xdb   : > { %v509_v61 = vpop.f32.mrf.mxu0  ;;  %v539_v62 = vpop.f32.mrf.mxu1 }
  0xdc   : > { %v1536_v63 = vpop.eup %1535  ;;  %v540_v0 = vadd.f32 %v539_v62, %v506_v10  ;;  %v585_v1 = vpop.f32.mrf.mxu2 }
  0xdd   : > { %v815_v30 = vmul.f32 %v1536_v63, %v1936_v14 }
  0xde   : > { %1537 = vtanh.f32 %v540_v0  ;;  %1225 = vmatmul.f32.gmra.mxu0 %v1806_v43  ;;  %1261 = vmatmul.f32.gmra.mxu1 %v1797_v38  ;;  %v355_v43 = vadd.f32 %v1914_v35, %v1944_v23  ;;  %v1957_v10 = vpop.permute.xlu1 %810 }
  0xdf   : > { %v821_v17 = vadd.f32 %v815_v30, %v813_v3  ;;  %1337 = vmatmul.f32.gmra.mxu3 %v1799_v39 }
  0xe0   : > { %1303 = vmatmul.f32.gmra.mxu2 %v1799_v39  ;;  %v393_v20 = vadd.f32 %v392_v45, %v355_v43 }
  0xe2   : > { %v631_v7 = vpop.f32.mrf.mxu3  ;;  %v432_v25 = vadd.f32 %v431_v49, %v393_v20 }
  0xe3   : > { %v543_v11 = vpop.f32.mrf.mxu1  ;;  %v655_v12 = vpop.f32.mrf.mxu0 }
  0xe4   : > { %v1538_v13 = vpop.eup %1537  ;;  %v593_v15 = vpop.f32.mrf.mxu2  ;;  %v474_v28 = vadd.f32 %v1920_v44, %v432_v25  ;;  %v656_v41 = vadd.f32 %v655_v12, %v620_v33 }
  0xe5   : > { %v817_v18 = vmul.f32 %v1538_v13, %v1946_v5  ;;  %v594_v50 = vadd.f32 %v593_v15, %v1944_v23 }
  0xe6   : > { %1267 = vmatmul.f32.gmra.mxu1 %v1816_v46  ;;  %v510_v36 = vadd.f32 %v509_v61, %v474_v28  ;;  %v586_v46 = vadd.f32 %v585_v1, %v1907_v29 }
  0xe7   : > { %v822_v38 = vadd.f32 %v821_v17, %v817_v18  ;;  %v632_v9 = vadd.f32 %v631_v7, %v594_v50 }
  0xe8   : > { %v544_v42 = vadd.f32 %v543_v11, %v510_v36  ;;  %v628_v49 = vadd.f32 %v627_v60, %v586_v46 }
  0xea   : > { %v770_v22 = vpop.f32.mrf.mxu3  ;;  %1539 = vtanh.f32 %v544_v42 }
  0xeb   : > { %v660_v39 = vpop.f32.mrf.mxu0  ;;  %v694_v21 = vpop.f32.mrf.mxu1 }
  0xec   : > { %v736_v24 = vpop.f32.mrf.mxu2  ;;  %v661_v37 = vadd.f32 %v660_v39, %v624_v31  ;;  %v695_v47 = vadd.f32 %v694_v21, %v656_v41 }
  0xee   : > { %v737_v44 = vadd.f32 %v736_v24, %v695_v47 }
  0xf0   : > { %v771_v58 = vadd.f32 %v770_v22, %v737_v44  ;;  %v1540_v59 = vpop.eup %1539 }
  0xf1   : > { %v819_v63 = vmul.f32 %v1540_v59, %v1957_v10 }
  0xf2   : > { %v774_v32 = vpop.f32.mrf.mxu3 }
  0xf3   : > { %v665_v34 = vpop.f32.mrf.mxu0  ;;  %v700_v35 = vpop.f32.mrf.mxu1  ;;  %v823_v11 = vadd.f32 %v822_v38, %v819_v63  ;;  %v1967_v63 = vstv %s263_s26 }
  0xf4   : > { %v740_v40 = vpop.f32.mrf.mxu2  ;;  %v701_v45 = vadd.f32 %v700_v35, %v661_v37  ;;  %v666_v51 = vadd.f32 %v665_v34, %v628_v49 }
  0xf5   : > { %v824_v20 = vrot.slane %v823_v11, 4 }
  0xf6   : > { %v741_v52 = vadd.f32 %v740_v40, %v701_v45 }
  0xf7   : > { %v825_v28 = vadd.f32 %v824_v20, %v823_v11 }
  0xf8   : > { %v775_v57 = vadd.f32 %v774_v32, %v741_v52 }
  0xf9   : > { %v826_v37 = vrot.slane %v825_v28, 2 }
  0xfa   : > { %v778_v53 = vpop.f32.mrf.mxu3  ;;  %1541 = vtanh.f32 %v775_v57 }
  0xfb   : > { %v670_v54 = vpop.f32.mrf.mxu0  ;;  %v706_v48 = vpop.f32.mrf.mxu1  ;;  %1543 = vtanh.f32 %v771_v58  ;;  %v827_v52 = vadd.f32 %v826_v37, %v825_v28 }
  0xfc   : > { %v707_v4 = vadd.f32 %v706_v48, %v666_v51  ;;  %v744_v56 = vpop.f32.mrf.mxu2  ;;  %v671_v60 = vadd.f32 %v670_v54, %v632_v9 }
  0xfe   : > { %v745_v2 = vadd.f32 %v744_v56, %v707_v4  ;;  %v828_v4 = vrot.slane %v827_v52, 1 }
 0x100   : > { %v779_v61 = vadd.f32 %v778_v53, %v745_v2  ;;  %v1542_v12 = vpop.eup %1541 }
 0x101   : > { %v1544_v15 = vpop.eup %1543  ;;  %v816_v22 = vmul.f32 %v1542_v12, %v1936_v14 }
 0x102   : > { %v782_v62 = vpop.f32.mrf.mxu3  ;;  %1545 = vtanh.f32 %v779_v61  ;;  %v814_v26 = vmul.f32 %v1544_v15, %v1930_v55 }
 0x103   : > { %v712_v0 = vpop.f32.mrf.mxu1  ;;  %v886_v1 = vpop.f32.mrf.mxu0 }
 0x104   : > { %v713_v3 = vadd.f32 %v712_v0, %v671_v60  ;;  %v748_v30 = vpop.f32.mrf.mxu2  ;;  %v887_v13 = vadd.f32 %v886_v1, %v1892_v6  ;;  %v830_v31 = vadd.f32 %v816_v22, %v814_v26  ;;  %v829_v60 = vadd.f32 %v828_v4, %v827_v52 }
 0x106   : > { %v749_v17 = vadd.f32 %v748_v30, %v713_v3  ;;  %v848_v3 = vmul.f32 0.01, %v1747_v8 }
 0x108   : > { %v783_v7 = vadd.f32 %v782_v62, %v749_v17  ;;  %v1546_v18 = vpop.eup %1545  ;;  %v840_v17 = vadd.f32 %v1967_v63, %v829_v60 }
 0x109   : > { %v818_v27 = vmul.f32 %v1546_v18, %v1946_v5 }
 0x10a   : > { %1547 = vtanh.f32 %v783_v7  ;;  %v1011_v43 = vpop.f32.mrf.mxu3 }
 0x10b   : > { %v894_v39 = vpop.f32.mrf.mxu0  ;;  %v936_v21 = vpop.f32.mrf.mxu1  ;;  %v831_v35 = vadd.f32 %v830_v31, %v818_v27 }
 0x10c   : > { %v937_v24 = vadd.f32 %v936_v21, %v887_v13  ;;  %v972_v25 = vpop.f32.mrf.mxu2  ;;  %v895_v33 = vadd.f32 %v894_v39, %v1900_v19 }
 0x10e   : > { %v973_v38 = vadd.f32 %v972_v25, %v937_v24 }
 0x110   : > { %v1548_v32 = vpop.eup %1547  ;;  %v1012_v34 = vadd.f32 %v1011_v43, %v973_v38  ;;  %v849_v43 = vmul.f32 %v848_v3, %v1747_v8 }
 0x111   : > { %v820_v36 = vmul.f32 %v1548_v32, %v1957_v10 }
 0x112   : > { %v1017_v46 = vpop.f32.mrf.mxu3 }
 0x113   : > { %v832_v40 = vadd.f32 %v831_v35, %v820_v36  ;;  %v902_v41 = vpop.f32.mrf.mxu0  ;;  %v940_v42 = vpop.f32.mrf.mxu1 }
 0x114   : > { %v941_v45 = vadd.f32 %v940_v42, %v895_v33  ;;  %v977_v47 = vpop.f32.mrf.mxu2  ;;  %v903_v44 = vadd.f32 %v902_v41, %v1907_v29 }
 0x115   : > { %v833_v49 = vrot.slane %v832_v40, 4 }
 0x116   : > { %v978_v51 = vadd.f32 %v977_v47, %v941_v45 }
 0x117   : > { %v834_v53 = vadd.f32 %v833_v49, %v832_v40 }
 0x118   : > { %v1018_v54 = vadd.f32 %v1017_v46, %v978_v51 }
 0x119   : > { %v835_v48 = vrot.slane %v834_v53, 2 }
 0x11a   : > { %v1023_v50 = vpop.f32.mrf.mxu3 }
 0x11b   : > { %v836_v56 = vadd.f32 %v835_v48, %v834_v53  ;;  %v910_v57 = vpop.f32.mrf.mxu0  ;;  %v944_v2 = vpop.f32.mrf.mxu1 }
 0x11c   : > { %v945_v58 = vadd.f32 %v944_v2, %v903_v44  ;;  %v982_v59 = vpop.f32.mrf.mxu2 }
 0x11d   : > { %v837_v9 = vrot.slane %v836_v56, 1 }
 0x11e   : > { %v983_v61 = vadd.f32 %v982_v59, %v945_v58 }
 0x11f   : > { %v838_v62 = vadd.f32 %v837_v9, %v836_v56 }
 0x120   : > { %v1024_v0 = vadd.f32 %v1023_v50, %v983_v61  ;;  %v911_v50 = vadd.f32 %v910_v57, %v1944_v23 }
 0x121   : > { %v841_v1 = vadd.f32 %v1967_v63, %v838_v62 }
 0x122   : > { %v1029_v30 = vpop.f32.mrf.mxu3 }
 0x123   : > { %v844_v11 = vrot.slane %v841_v1, 4  ;;  %v948_v12 = vpop.f32.mrf.mxu1  ;;  %v1053_v13 = vpop.f32.mrf.mxu0 }
 0x124   : > { %v987_v7 = vpop.f32.mrf.mxu2  ;;  %v1054_v26 = vadd.f32 %v1053_v13, %v1012_v34  ;;  %v949_v56 = vadd.f32 %v948_v12, %v911_v50 }
 0x125   : > { %v845_v15 = vsel %vm302_vm1, %v840_v17, %v844_v11 }
 0x126   : > { %v847_v18 = vmul.f32 %v845_v15, %v1747_v8  ;;  %v988_v61 = vadd.f32 %v987_v7, %v949_v56 }
 0x128   : > { %v850_v20 = vmul.f32 %v847_v18, %v847_v18 }
 0x12a   : > { %v851_v22 = vadd.f32 %v850_v20, %v849_v43  ;;  %v1175_v39 = vpop.f32.mrf.mxu3 }
 0x12b   : > { %v1057_v21 = vpop.f32.mrf.mxu0  ;;  %v1087_v24 = vpop.f32.mrf.mxu1 }
 0x12c   : > { %852 = vst [vmem:[%s1977_s7] sm:$0xff] %v851_v22  ;;  %v1125_v25 = vpop.f32.mrf.mxu2  ;;  %v1088_v27 = vadd.f32 %v1087_v24, %v1054_v26  ;;  %v1058_v38 = vadd.f32 %v1057_v21, %v1018_v54 }
 0x12d   : > { %v1126_v62 = vadd.f32 %v1125_v25, %v1892_v6 }
 0x12e   : > { %1549 = vtanh.f32 %v1088_v27 }
 0x12f   : > { %v1176_v17 = vadd.f32 %v1175_v39, %v1126_v62 }
 0x132   : > { %v1179_v28 = vpop.f32.mrf.mxu3 }
 0x133   : > { %v1061_v31 = vpop.f32.mrf.mxu0  ;;  %v1091_v32 = vpop.f32.mrf.mxu1 }
 0x134   : > { %v1092_v33 = vadd.f32 %v1091_v32, %v1058_v38  ;;  %v1133_v35 = vpop.f32.mrf.mxu2  ;;  %v1550_v8 = vpop.eup %1549  ;;  %v1062_v36 = vadd.f32 %v1061_v31, %v1024_v0  ;;  %v1030_v0 = vadd.f32 %v1029_v30, %v988_v61 }
 0x135   : > { %v1349_v47 = vmul.f32 %v1550_v8, %v1930_v55  ;;  %v1134_v60 = vadd.f32 %v1133_v35, %v1900_v19 }
 0x136   : > { %1551 = vtanh.f32 %v1092_v33 }
 0x137   : > { %v1180_v1 = vadd.f32 %v1179_v28, %v1134_v60 }
 0x13a   : > { %v1183_v46 = vpop.f32.mrf.mxu3 }
 0x13b   : > { %v1065_v37 = vpop.f32.mrf.mxu0  ;;  %v1095_v40 = vpop.f32.mrf.mxu1 }
 0x13c   : > { %v1552_v41 = vpop.eup %1551  ;;  %v1096_v42 = vadd.f32 %v1095_v40, %v1062_v36  ;;  %v1141_v45 = vpop.f32.mrf.mxu2  ;;  %v1066_v13 = vadd.f32 %v1065_v37, %v1030_v0 }
 0x13d   : > { %v1351_v34 = vmul.f32 %v1552_v41, %v1936_v14  ;;  %v1142_v15 = vadd.f32 %v1141_v45, %v1907_v29 }
 0x13e   : > { %1553 = vtanh.f32 %v1096_v42 }
 0x13f   : > { %v1357_v49 = vadd.f32 %v1351_v34, %v1349_v47  ;;  %v1184_v7 = vadd.f32 %v1183_v46, %v1142_v15 }
 0x142   : > { %v1187_v51 = vpop.f32.mrf.mxu3 }
 0x143   : > { %v1099_v52 = vpop.f32.mrf.mxu1  ;;  %v1211_v53 = vpop.f32.mrf.mxu0 }
 0x144   : > { %v1554_v44 = vpop.eup %1553  ;;  %v1149_v54 = vpop.f32.mrf.mxu2  ;;  %v1212_v12 = vadd.f32 %v1211_v53, %v1176_v17  ;;  %v1100_v20 = vadd.f32 %v1099_v52, %v1066_v13 }
 0x145   : > { %v1353_v48 = vmul.f32 %v1554_v44, %v1946_v5  ;;  %v1150_v39 = vadd.f32 %v1149_v54, %v1944_v23 }
 0x146   : > { %1555 = vtanh.f32 %v1100_v20 }
 0x147   : > { %v1358_v4 = vadd.f32 %v1357_v49, %v1353_v48  ;;  %v1188_v33 = vadd.f32 %v1187_v51, %v1150_v39 }
 0x14a   : > { %v1326_v2 = vpop.f32.mrf.mxu3 }
 0x14b   : > { %v1216_v58 = vpop.f32.mrf.mxu0  ;;  %v1250_v59 = vpop.f32.mrf.mxu1 }
 0x14c   : > { %v1292_v9 = vpop.f32.mrf.mxu2  ;;  %v1217_v57 = vadd.f32 %v1216_v58, %v1180_v1  ;;  %v1251_v21 = vadd.f32 %v1250_v59, %v1212_v12  ;;  %v1556_v32 = vpop.eup %1555 }
 0x14d   : > { %v1355_v36 = vmul.f32 %v1556_v32, %v1957_v10 }
 0x14e   : > { %v1293_v6 = vadd.f32 %v1292_v9, %v1251_v21 }
 0x14f   : > { %v1359_v42 = vadd.f32 %v1358_v4, %v1355_v36 }
 0x150   : > { %v1327_v28 = vadd.f32 %v1326_v2, %v1293_v6 }
 0x151   : > { %v1360_v52 = vrot.slane %v1359_v42, 4 }
 0x152   : > { %v1330_v3 = vpop.f32.mrf.mxu3 }
 0x153   : > { %v1256_v11 = vpop.f32.mrf.mxu1  ;;  %v1221_v43 = vpop.f32.mrf.mxu0  ;;  %v1361_v54 = vadd.f32 %v1360_v52, %v1359_v42 }
 0x154   : > { %v1296_v18 = vpop.f32.mrf.mxu2  ;;  %v1257_v22 = vadd.f32 %v1256_v11, %v1217_v57  ;;  %v1222_v19 = vadd.f32 %v1221_v43, %v1184_v7 }
 0x155   : > { %v1362_v58 = vrot.slane %v1361_v54, 2 }
 0x156   : > { %v1297_v24 = vadd.f32 %v1296_v18, %v1257_v22 }
 0x157   : > { %v1363_v9 = vadd.f32 %v1362_v58, %v1361_v54 }
 0x158   : > { %v1331_v38 = vadd.f32 %v1330_v3, %v1297_v24  ;;  %v1383_v3 = vmul.f32 0.01, %v1767_v16 }
 0x159   : > { %v1364_v62 = vrot.slane %v1363_v9, 1 }
 0x15a   : > { %v1334_v25 = vpop.f32.mrf.mxu3  ;;  %1557 = vtanh.f32 %v1331_v38  ;;  %v1384_v13 = vmul.f32 %v1767_v16, %v1383_v3 }
 0x15b   : > { %v1262_v30 = vpop.f32.mrf.mxu1  ;;  %v1226_v31 = vpop.f32.mrf.mxu0  ;;  %1559 = vtanh.f32 %v1327_v28 }
 0x15c   : > { %v1263_v26 = vadd.f32 %v1262_v30, %v1222_v19  ;;  %v1300_v27 = vpop.f32.mrf.mxu2  ;;  %v1227_v8 = vadd.f32 %v1226_v31, %v1188_v33 }
 0x15e   : > { %v1301_v29 = vadd.f32 %v1300_v27, %v1263_v26 }
 0x160   : > { %v1335_v35 = vadd.f32 %v1334_v25, %v1301_v29  ;;  %v1558_v45 = vpop.eup %1557 }
 0x161   : > { %v1560_v34 = vpop.eup %1559  ;;  %v1352_v51 = vmul.f32 %v1558_v45, %v1936_v14 }
 0x162   : > { %1561 = vtanh.f32 %v1335_v35  ;;  %v1338_v41 = vpop.f32.mrf.mxu3  ;;  %v1350_v53 = vmul.f32 %v1560_v34, %v1930_v55  ;;  %v1365_v55 = vadd.f32 %v1364_v62, %v1363_v9 }
 0x163   : > { %v1268_v46 = vpop.f32.mrf.mxu1 }
 0x164   : > { %v1269_v37 = vadd.f32 %v1268_v46, %v1227_v8  ;;  %v1304_v40 = vpop.f32.mrf.mxu2  ;;  %v1366_v48 = vadd.f32 %v1352_v51, %v1350_v53  ;;  %v1375_v17 = vadd.f32 %v1365_v55, %v1967_v63 }
 0x166   : > { %v1305_v23 = vadd.f32 %v1304_v40, %v1269_v37 }
 0x168   : > { %v1339_v47 = vadd.f32 %v1338_v41, %v1305_v23  ;;  %v1562_v49 = vpop.eup %1561 }
 0x169   : > { %v1354_v44 = vmul.f32 %v1562_v49, %v1946_v5 }
 0x16a   : > { %1563 = vtanh.f32 %v1339_v47 }
 0x16b   : > { %v1367_v56 = vadd.f32 %v1366_v48, %v1354_v44 }
 0x170   : > { %v1564_v50 = vpop.eup %1563 }
 0x171   : > { %v1356_v2 = vmul.f32 %v1564_v50, %v1957_v10 }
 0x173   : > { %v1368_v4 = vadd.f32 %v1367_v56, %v1356_v2 }
 0x175   : > { %v1369_v59 = vrot.slane %v1368_v4, 4 }
 0x177   : > { %v1370_v61 = vadd.f32 %v1369_v59, %v1368_v4 }
 0x179   : > { %v1371_v60 = vrot.slane %v1370_v61, 2 }
 0x17b   : > { %v1372_v14 = vadd.f32 %v1371_v60, %v1370_v61 }
 0x17d   : > { %v1373_v0 = vrot.slane %v1372_v14, 1 }
 0x17f   : > { %v1374_v1 = vadd.f32 %v1373_v0, %v1372_v14 }
 0x181   : > { %v1376_v5 = vadd.f32 %v1374_v1, %v1967_v63 }
 0x183   : > { %v1379_v10 = vrot.slane %v1376_v5, 4 }
 0x185   : > { %v1380_v11 = vsel %vm302_vm1, %v1375_v17, %v1379_v10 }
 0x186   : > { %v1382_v15 = vmul.f32 %v1767_v16, %v1380_v11 }
 0x188   : > { %v1385_v57 = vmul.f32 %v1382_v15, %v1382_v15  ;;  %1396 = sbr.rel (!%p1713_p5) target bundleno = 427 (0x1ab), region = 44 }
 0x18a   : > { %v1386_v18 = vadd.f32 %v1385_v57, %v1384_v13 }
 0x18c   : > { %1480 = vst [vmem:[%s1977_s7 + $0x8] sm:$0xff] %v1386_v18 }
 0x18d   : > { %s2069_s9 = smov (!%p1399_p11, %s1398_s9), 4 }
 0x18e   : > { %s1483_s10 = sshll.u32 %s2069_s9, 2 }
 0x18f   : > { %s1402_s11 = ssub.s32 16, %s1483_s10 }
 0x190   : > { %s1403_s12 = sshll.u32 %s1402_s11, 4 }
 0x191   : > { %1404 = vsyncadd %s2002_s8, %s1403_s12  ;;  %p2011_p12 = scmp.ne.s32.totalorder %s1483_s10, 0  ;;  %s1490_s29 = sshll.u32 %s1696_s4, 4 }
 0x192   : > { %s1407_s15 = scalar_lea.hbm %s2060_s5, %s1490_s29  ;;  %s1487_s16 = sshll.u32 %s2069_s9, 6 }
 0x193   : > { %s1410_s17 = sshll.u32 %s1977_s7, 4  ;;  %s1412_s18 = sshll.u32 %s1407_s15, 4  ;;  %s1411_s17 = int_to_ptr.vmem [resolvable:$true] %s1410_s17  ;;  %s1413_s18 = int_to_ptr.hbm [resolvable:$true] %s1412_s18 }
 0x194   : > { %s1565_s19 = sshra.s32 %s1411_s17, 4  ;;  %s1567_s24 = sshrl.u32 %s1487_s16, 4  ;;  %s1566_s19 = int_to_ptr.vmem [resolvable:$true] %s1565_s19 }
 0x195   : > { %s1572_s26 = scalar_lea.vmem %s1566_s19, %s1567_s24  ;;  %s1641_s27 = smov [#allocation3]  }
 0x196   : > { %p1573_p13 = scmp.ne.s32.totalorder %s1566_s19, %s1572_s26  ;;  %s1576_s4 = scalar_lea.vmem %s1641_s27, 32 }
 0x197   : > { %p1578_p2 = scmp.lt.s32.totalorder %s1576_s4, %s1572_s26 }
 0x198   : > { %p1574_p0 = pnand %p1573_p13, %p2011_p12 }
 0x19a   : > { %p1575_p1 = pneg %p1574_p0 }
 0x19c   : > { %p1580_p3 = pnand %p1578_p2, %p1575_p1 }
 0x19e   : > { %1583 = shalt.err (!%p1580_p3)
}
 0x19f   : > { %s1584_s10 = sshra.s32 %s1413_s18, 4  ;;  %s1595_s29 = scalar_lea.hbm %s2060_s5, 20  ;;  %s1585_s10 = int_to_ptr.hbm [resolvable:$true] %s1584_s10 }
 0x1a0   : > { %s1591_s7 = scalar_lea.hbm %s1585_s10, %s1567_s24  ;;  %p1596_p8 = scmp.lt.s32.totalorder %s1585_s10, %s2060_s5 }
 0x1a1   : > { %p1592_p4 = scmp.ne.s32.totalorder %s1585_s10, %s1591_s7  ;;  %p1597_p9 = scmp.lt.s32.totalorder %s1595_s29, %s1591_s7 }
 0x1a3   : > { %p1593_p5 = pnand %p1592_p4, %p2011_p12  ;;  %p1598_p10 = por %p1597_p9, %p1596_p8 }
 0x1a5   : > { %p1594_p7 = pneg %p1593_p5 }
 0x1a7   : > { %p1599_p11 = pnand %p1598_p10, %p1594_p7 }
 0x1a9   : > { %1602 = shalt.err (!%p1599_p11)
}
 0x1aa   : > { %1415 = dma.vmem_to_hbm [thread:$0]  (%p2011_p12), %s1411_s17, %s1487_s16, %s1413_s18, %s2002_s8  }
 0x1ab PF: > { %p1496_p13 = scmp.ge.s32.totalorder %s1638_s23, 2  ;;  %s1424_s15 = sand.u32 1, %s1626_s20  }
 0x1ac   : > { %s1425_s19 = scalar_lea.sflag [#allocation4], %s1424_s15 }
 0x1ad   : > { %p1493_p0 = pnand %p1496_p13, %p1717_p6 }
 0x1af   : > { %p1494_p1 = pneg %p1493_p0 }
 0x1b1   : > { %1621 = dma.done.wait (%p1494_p1), %s1425_s19, 256  }
 0x1b2   : > { %1623 = vsyncadd (%p1494_p1), %s1425_s19, 4294967040  ;;  %p16_p2 = scmp.ge.s32.totalorder %s1700_s25, 4   ;;  %s2064_s20 = smov %s1630_s21 }
 0x1b3   : > { %s2065_s21 = smov %s1634_s22  ;;  %s2066_s22 = smov %s1711_s28 }
 0x1b4   : > { %s2067_s23 = smov %s1700_s25  ;;  %18 = sbr.rel (!%p16_p2) target bundleno = 5 (0x5), region = 77 }
 0x1b9   :  { %1431 = vsyncpa [#allocation4], 1 }
 0x1ba   :  { %1433 = vsyncpa [#allocation4 + $0x1], 1 }

</bundles_post_ra>
